<compile_context>
chip_gen: v7x
topology: tpu7x:2x2x1
jax: 0.10.0
libtpu: 0.0.40
codegen_flags: <defaults>
</compile_context>

<pallas_src>
import numpy as np
import jax
import jax.numpy as jnp
from jax.experimental import pallas as pl
from jax.experimental.pallas import tpu as pltpu

DIMS = 16
USE_SE_NET = "false"

DATATYPES = (
    {"type": "SparseEncoder", "length": 32, "index": 0},
    {"type": "MultiSparseEncoder", "length": 32, "index": 1, "size": 4},
    {"type": "DenseEncoder",
     "length": (-1.0, 0.2, 0.4, 0.6, 0.8, 2.0),  # bucketize thresholds (vocab = 6)
     "index": 5},
)

V1 = DATATYPES[0]["length"]          # SparseEncoder vocab
V2 = DATATYPES[1]["length"]          # MultiSparseEncoder vocab
V3 = len(DATATYPES[2]["length"])     # DenseEncoder vocab (num thresholds)
S_MS = DATATYPES[1]["size"]          # bag size
NUM_ENC = 3
OUT_D = NUM_ENC * DIMS               # concatenated output width (48)

TB_MAX = 2048                        # per perf review: 2048-4096; ~few MiB VMEM, fits all gens


def _round_up(n, m):
    return (n + m - 1) // m * m


K_FUSED = _round_up(V1 + V2 + V3, 8)  # contraction dim of the fused block-diag table


def embedding_kernel(x_ref, table_ref, out_ref):
    """Fused gather: block-diag one-hot activation @ fused table on the MXU."""
    f32 = jnp.float32
    i32 = jnp.int32
    B = x_ref.shape[0]

    sp_col = DATATYPES[0]["index"]
    ms_col = DATATYPES[1]["index"]
    de_col = DATATYPES[2]["index"]

    lane = jax.lax.broadcasted_iota(i32, (B, K_FUSED), 1)

    # --- SparseEncoder: nn.Embedding(x[:, 0].int()) -> lanes [0, V1) ----------------
    # NOTE: out-of-vocab indices (>= V1) would silently alias into other lane ranges;
    # PyTorch would raise out-of-range instead (inputs are assumed in-vocab).
    idx_sp = x_ref[:, sp_col:sp_col + 1].astype(i32)                    # (B, 1)
    acc = (lane == idx_sp).astype(i32)

    # --- DenseEncoder: torch.bucketize(x[:, 5], thr, right=False) + nn.Embedding -----
    # Thresholds are unrolled as Python scalars (compile-time constants): bucket =
    # count of thresholds strictly below x. No array constant captured, no XLU reduce.
    x_de = x_ref[:, de_col:de_col + 1]                                  # (B, 1)
    bucket = jnp.zeros((B, 1), i32)
    for t in DATATYPES[2]["length"]:
        bucket = bucket + (x_de > t).astype(i32)
    # bucket == V3 (x above max threshold) lands on a zero-padded fused-table row
    # (zero vector); PyTorch's nn.Embedding(V3, D) would raise out-of-range instead.
    acc = acc + (lane == (V1 + V2 + bucket)).astype(i32)

    # --- MultiSparseEncoder: nn.EmbeddingBag(mode='mean', padding_idx=0) ------------
    # One-hots accumulate directly into `acc` over lanes [V1, V1+V2), explicitly masked
    # by (col != 0) so padding rows never contribute (no reliance on e_ms[0] == 0).
    cnt = jnp.zeros((B, 1), i32)
    for s in range(S_MS):                                               # S small & static
        col = x_ref[:, ms_col + s:ms_col + s + 1].astype(i32)           # (B, 1)
        nz = col != 0
        acc = acc + ((lane == (V1 + col)) & nz).astype(i32)
        cnt = cnt + nz.astype(i32)

    # --- Single fused MXU matmul (single int->f32 convert of the activation) --------
    act = acc.astype(f32)
    out = jnp.dot(act, table_ref[...], preferred_element_type=f32)

    # Mean scaling for the multi-sparse block only, applied post-matmul on the 16
    # real output lanes [DIMS, 2*DIMS) instead of the 128-lane-padded activation.
    inv = 1.0 / jnp.maximum(cnt.astype(f32), 1.0)                       # (B, 1)
    lane_o = jax.lax.broadcasted_iota(i32, (B, OUT_D), 1)
    scale = jnp.where((lane_o >= DIMS) & (lane_o < 2 * DIMS), inv, 1.0)
    out_ref[...] = out * scale                                          # one full-tile store


def make_fused_table(e_sp, e_ms, e_de):
    """Block-diagonal (K_FUSED, 3*D) table so one matmul covers all three encoders."""
    table = jnp.zeros((K_FUSED, OUT_D), jnp.float32)
    table = table.at[0:V1, 0:DIMS].set(e_sp)
    table = table.at[V1:V1 + V2, DIMS:2 * DIMS].set(e_ms)
    table = table.at[V1 + V2:V1 + V2 + V3, 2 * DIMS:3 * DIMS].set(e_de)
    return table


def init_params(key):
    """Deterministic stand-in for nn.Embedding / nn.EmbeddingBag init (N(0,1) weights)."""
    k1, k2, k3 = jax.random.split(key, 3)
    e_sp = jax.random.normal(k1, (V1, DIMS), jnp.float32)
    e_ms = jax.random.normal(k2, (V2, DIMS), jnp.float32)
    e_ms = e_ms.at[0].set(0.0)  # EmbeddingBag padding_idx=0 row (kernel masks anyway)
    e_de = jax.random.normal(k3, (V3, DIMS), jnp.float32)
    return e_sp, e_ms, e_de


@jax.jit
def embedding_module_forward(x, e_sp, e_ms, e_de):
    B, F = x.shape
    table = make_fused_table(e_sp, e_ms, e_de)

    # Balanced batch tiles: cap at TB_MAX, keep padding per step < 8 rows, and give v7x
    # at least 2 grid steps (2-TC sharding) whenever there's enough work to split.
    n_steps = max(1, pl.cdiv(B, TB_MAX))
    if n_steps < 2 and B > 8:
        n_steps = 2
    TB = _round_up(pl.cdiv(B, n_steps), 8)
    n_steps = pl.cdiv(B, TB)
    Bp = n_steps * TB
    if Bp != B:
        x = jnp.pad(x, ((0, Bp - B), (0, 0)))

    out = pl.pallas_call(
        embedding_kernel,
        out_shape=jax.ShapeDtypeStruct((Bp, OUT_D), jnp.float32),
        grid_spec=pltpu.PrefetchScalarGridSpec(
            num_scalar_prefetch=0,
            grid=(n_steps,),
            in_specs=[
                pl.BlockSpec((TB, F), lambda i: (i, 0)),            # packed features
                pl.BlockSpec((K_FUSED, OUT_D), lambda i: (0, 0)),   # fused table (resident)
            ],
            out_specs=pl.BlockSpec((TB, OUT_D), lambda i: (i, 0)),
        ),
        compiler_params=pltpu.CompilerParams(
            dimension_semantics=("parallel",)),   # 2-TC sharding on v7x
    )(x, table)
    return out[:B]


def reference_forward(x, e_sp, e_ms, e_de):
    """Pure-JAX replica of the PyTorch forward (use_se_net='false')."""
    dt_sp, dt_ms, dt_de = DATATYPES
    v1 = e_sp[x[:, dt_sp["index"]].astype(jnp.int32)]
    idx = x[:, dt_ms["index"]:dt_ms["index"] + dt_ms["size"]].astype(jnp.int32)
    mask = (idx != 0).astype(jnp.float32)
    gathered = e_ms[idx]                                            # (B, S, D)
    v2 = jnp.einsum("bs,bsd->bd", mask, gathered) / jnp.maximum(
        mask.sum(axis=1, keepdims=True), 1.0)
    thr = jnp.asarray(dt_de["length"], jnp.float32)
    b = jnp.searchsorted(thr, x[:, dt_de["index"]], side="left")    # == torch.bucketize
    v3 = e_de[b]
    return jnp.concatenate([v1, v2, v3], axis=1).astype(jnp.float32)


if __name__ == "__main__":
    key = jax.random.PRNGKey(0)
    kp, kx1, kx2, kx3, kx4 = jax.random.split(key, 5)

    B, F = 8, 8  # batch=8, feature columns: [sparse, multi x4, dense, 2 unused]
    e_sp, e_ms, e_de = init_params(kp)

    col_sparse = jax.random.randint(kx1, (B, 1), 0, V1).astype(jnp.float32)
    # multi-sparse bag indices: guarantee at least one non-padding (>=1) entry per row
    col_multi_first = jax.random.randint(kx2, (B, 1), 1, V2).astype(jnp.float32)
    col_multi_rest = jax.random.randint(kx3, (B, 3), 0, V2).astype(jnp.float32)
    col_dense = jax.random.uniform(kx4, (B, 1), minval=0.0, maxval=1.0)
    col_unused = jnp.zeros((B, 2), jnp.float32)
    x = jnp.concatenate(
        [col_sparse, col_multi_first, col_multi_rest, col_dense, col_unused], axis=1)

    out = embedding_module_forward(x, e_sp, e_ms, e_de)
    out = jax.block_until_ready(out)

    ref = reference_forward(x, e_sp, e_ms, e_de)
    np.testing.assert_allclose(np.asarray(out), np.asarray(ref), rtol=1e-5, atol=1e-5)
    assert out.shape == (B, OUT_D) and out.dtype == jnp.float32

    print("KERNEL_OK")
</pallas_src>

<mosaic_0001>
module attributes {stable_mosaic.version = 11 : i64} {
  func.func @embedding_kernel(%arg0: i32, %arg1: memref<8x8xf32, #tpu.memory_space<vmem>>, %arg2: memref<72x48xf32, #tpu.memory_space<vmem>>, %arg3: memref<8x48xf32, #tpu.memory_space<vmem>>) attributes {dimension_semantics = [#tpu.dimension_semantics<parallel>], iteration_bounds = array<i64: 1>, scalar_prefetch = 0 : i64, scratch_operands = 0 : i64, tpu.core_type = #tpu.core_type<tc>, window_params = [{transform_indices = @transform_0, window_bounds = array<i64: 8, 8>}, {pipeline_mode = #tpu.pipeline_mode<synchronous>, transform_indices = @transform_1, window_bounds = array<i64: 72, 48>}, {transform_indices = @transform_2, window_bounds = array<i64: 8, 48>}]} {
    %0 = tpu.iota {dimensions = array<i32: 1>} : vector<8x72xi32>
    %c0 = arith.constant 0 : index
    %c0_0 = arith.constant 0 : index
    %1 = vector.load %arg1[%c0, %c0_0] : memref<8x8xf32, #tpu.memory_space<vmem>>, vector<8x1xf32>
    %2 = arith.fptosi %1 : vector<8x1xf32> to vector<8x1xi32>
    %3 = vector.broadcast %2 : vector<8x1xi32> to vector<8x72xi32>
    %4 = arith.cmpi eq, %0, %3 : vector<8x72xi32>
    %5 = arith.extui %4 : vector<8x72xi1> to vector<8x72xi32>
    %c0_1 = arith.constant 0 : index
    %c5 = arith.constant 5 : index
    %6 = vector.load %arg1[%c0_1, %c5] : memref<8x8xf32, #tpu.memory_space<vmem>>, vector<8x1xf32>
    %c0_i32 = arith.constant 0 : i32
    %7 = vector.broadcast %c0_i32 : i32 to vector<8x1xi32>
    %cst = arith.constant -1.000000e+00 : f32
    %8 = vector.broadcast %cst : f32 to vector<8x1xf32>
    %9 = arith.cmpf ogt, %6, %8 : vector<8x1xf32>
    %10 = arith.extui %9 : vector<8x1xi1> to vector<8x1xi32>
    %11 = arith.addi %7, %10 : vector<8x1xi32>
    %cst_2 = arith.constant 2.000000e-01 : f32
    %12 = vector.broadcast %cst_2 : f32 to vector<8x1xf32>
    %13 = arith.cmpf ogt, %6, %12 : vector<8x1xf32>
    %14 = arith.extui %13 : vector<8x1xi1> to vector<8x1xi32>
    %15 = arith.addi %11, %14 : vector<8x1xi32>
    %cst_3 = arith.constant 4.000000e-01 : f32
    %16 = vector.broadcast %cst_3 : f32 to vector<8x1xf32>
    %17 = arith.cmpf ogt, %6, %16 : vector<8x1xf32>
    %18 = arith.extui %17 : vector<8x1xi1> to vector<8x1xi32>
    %19 = arith.addi %15, %18 : vector<8x1xi32>
    %cst_4 = arith.constant 6.000000e-01 : f32
    %20 = vector.broadcast %cst_4 : f32 to vector<8x1xf32>
    %21 = arith.cmpf ogt, %6, %20 : vector<8x1xf32>
    %22 = arith.extui %21 : vector<8x1xi1> to vector<8x1xi32>
    %23 = arith.addi %19, %22 : vector<8x1xi32>
    %cst_5 = arith.constant 8.000000e-01 : f32
    %24 = vector.broadcast %cst_5 : f32 to vector<8x1xf32>
    %25 = arith.cmpf ogt, %6, %24 : vector<8x1xf32>
    %26 = arith.extui %25 : vector<8x1xi1> to vector<8x1xi32>
    %27 = arith.addi %23, %26 : vector<8x1xi32>
    %cst_6 = arith.constant 2.000000e+00 : f32
    %28 = vector.broadcast %cst_6 : f32 to vector<8x1xf32>
    %29 = arith.cmpf ogt, %6, %28 : vector<8x1xf32>
    %30 = arith.extui %29 : vector<8x1xi1> to vector<8x1xi32>
    %31 = arith.addi %27, %30 : vector<8x1xi32>
    %c64_i32 = arith.constant 64 : i32
    %32 = vector.broadcast %c64_i32 : i32 to vector<8x1xi32>
    %33 = arith.addi %32, %31 : vector<8x1xi32>
    %34 = vector.broadcast %33 : vector<8x1xi32> to vector<8x72xi32>
    %35 = arith.cmpi eq, %0, %34 : vector<8x72xi32>
    %36 = arith.extui %35 : vector<8x72xi1> to vector<8x72xi32>
    %37 = arith.addi %5, %36 : vector<8x72xi32>
    %c0_i32_7 = arith.constant 0 : i32
    %38 = vector.broadcast %c0_i32_7 : i32 to vector<8x1xi32>
    %c0_8 = arith.constant 0 : index
    %c1 = arith.constant 1 : index
    %39 = vector.load %arg1[%c0_8, %c1] : memref<8x8xf32, #tpu.memory_space<vmem>>, vector<8x1xf32>
    %40 = arith.fptosi %39 : vector<8x1xf32> to vector<8x1xi32>
    %c0_i32_9 = arith.constant 0 : i32
    %41 = vector.broadcast %c0_i32_9 : i32 to vector<8x1xi32>
    %42 = arith.cmpi ne, %40, %41 : vector<8x1xi32>
    %c32_i32 = arith.constant 32 : i32
    %43 = vector.broadcast %c32_i32 : i32 to vector<8x1xi32>
    %44 = arith.addi %43, %40 : vector<8x1xi32>
    %45 = vector.broadcast %44 : vector<8x1xi32> to vector<8x72xi32>
    %46 = arith.cmpi eq, %0, %45 : vector<8x72xi32>
    %47 = vector.broadcast %42 : vector<8x1xi1> to vector<8x72xi1>
    %48 = arith.andi %46, %47 : vector<8x72xi1>
    %49 = arith.extui %48 : vector<8x72xi1> to vector<8x72xi32>
    %50 = arith.addi %37, %49 : vector<8x72xi32>
    %51 = arith.extui %42 : vector<8x1xi1> to vector<8x1xi32>
    %52 = arith.addi %38, %51 : vector<8x1xi32>
    %c0_10 = arith.constant 0 : index
    %c2 = arith.constant 2 : index
    %53 = vector.load %arg1[%c0_10, %c2] : memref<8x8xf32, #tpu.memory_space<vmem>>, vector<8x1xf32>
    %54 = arith.fptosi %53 : vector<8x1xf32> to vector<8x1xi32>
    %c0_i32_11 = arith.constant 0 : i32
    %55 = vector.broadcast %c0_i32_11 : i32 to vector<8x1xi32>
    %56 = arith.cmpi ne, %54, %55 : vector<8x1xi32>
    %c32_i32_12 = arith.constant 32 : i32
    %57 = vector.broadcast %c32_i32_12 : i32 to vector<8x1xi32>
    %58 = arith.addi %57, %54 : vector<8x1xi32>
    %59 = vector.broadcast %58 : vector<8x1xi32> to vector<8x72xi32>
    %60 = arith.cmpi eq, %0, %59 : vector<8x72xi32>
    %61 = vector.broadcast %56 : vector<8x1xi1> to vector<8x72xi1>
    %62 = arith.andi %60, %61 : vector<8x72xi1>
    %63 = arith.extui %62 : vector<8x72xi1> to vector<8x72xi32>
    %64 = arith.addi %50, %63 : vector<8x72xi32>
    %65 = arith.extui %56 : vector<8x1xi1> to vector<8x1xi32>
    %66 = arith.addi %52, %65 : vector<8x1xi32>
    %c0_13 = arith.constant 0 : index
    %c3 = arith.constant 3 : index
    %67 = vector.load %arg1[%c0_13, %c3] : memref<8x8xf32, #tpu.memory_space<vmem>>, vector<8x1xf32>
    %68 = arith.fptosi %67 : vector<8x1xf32> to vector<8x1xi32>
    %c0_i32_14 = arith.constant 0 : i32
    %69 = vector.broadcast %c0_i32_14 : i32 to vector<8x1xi32>
    %70 = arith.cmpi ne, %68, %69 : vector<8x1xi32>
    %c32_i32_15 = arith.constant 32 : i32
    %71 = vector.broadcast %c32_i32_15 : i32 to vector<8x1xi32>
    %72 = arith.addi %71, %68 : vector<8x1xi32>
    %73 = vector.broadcast %72 : vector<8x1xi32> to vector<8x72xi32>
    %74 = arith.cmpi eq, %0, %73 : vector<8x72xi32>
    %75 = vector.broadcast %70 : vector<8x1xi1> to vector<8x72xi1>
    %76 = arith.andi %74, %75 : vector<8x72xi1>
    %77 = arith.extui %76 : vector<8x72xi1> to vector<8x72xi32>
    %78 = arith.addi %64, %77 : vector<8x72xi32>
    %79 = arith.extui %70 : vector<8x1xi1> to vector<8x1xi32>
    %80 = arith.addi %66, %79 : vector<8x1xi32>
    %c0_16 = arith.constant 0 : index
    %c4 = arith.constant 4 : index
    %81 = vector.load %arg1[%c0_16, %c4] : memref<8x8xf32, #tpu.memory_space<vmem>>, vector<8x1xf32>
    %82 = arith.fptosi %81 : vector<8x1xf32> to vector<8x1xi32>
    %c0_i32_17 = arith.constant 0 : i32
    %83 = vector.broadcast %c0_i32_17 : i32 to vector<8x1xi32>
    %84 = arith.cmpi ne, %82, %83 : vector<8x1xi32>
    %c32_i32_18 = arith.constant 32 : i32
    %85 = vector.broadcast %c32_i32_18 : i32 to vector<8x1xi32>
    %86 = arith.addi %85, %82 : vector<8x1xi32>
    %87 = vector.broadcast %86 : vector<8x1xi32> to vector<8x72xi32>
    %88 = arith.cmpi eq, %0, %87 : vector<8x72xi32>
    %89 = vector.broadcast %84 : vector<8x1xi1> to vector<8x72xi1>
    %90 = arith.andi %88, %89 : vector<8x72xi1>
    %91 = arith.extui %90 : vector<8x72xi1> to vector<8x72xi32>
    %92 = arith.addi %78, %91 : vector<8x72xi32>
    %93 = arith.extui %84 : vector<8x1xi1> to vector<8x1xi32>
    %94 = arith.addi %80, %93 : vector<8x1xi32>
    %95 = arith.sitofp %92 : vector<8x72xi32> to vector<8x72xf32>
    %c0_19 = arith.constant 0 : index
    %c0_20 = arith.constant 0 : index
    %96 = vector.load %arg2[%c0_19, %c0_20] : memref<72x48xf32, #tpu.memory_space<vmem>>, vector<72x48xf32>
    %cst_21 = arith.constant dense<0.000000e+00> : vector<8x48xf32>
    %97 = tpu.matmul %95, %96, %cst_21 {dimension_numbers = #tpu.dot_dimension_numbers<[1], [0], [0], [1], [0, 0, 1, 1], [], []>} : vector<8x72xf32>, vector<72x48xf32>, vector<8x48xf32> -> vector<8x48xf32>
    %98 = arith.sitofp %94 : vector<8x1xi32> to vector<8x1xf32>
    %cst_22 = arith.constant 1.000000e+00 : f32
    %99 = vector.broadcast %cst_22 : f32 to vector<8x1xf32>
    %100 = arith.maximumf %98, %99 : vector<8x1xf32>
    %cst_23 = arith.constant 1.000000e+00 : f32
    %101 = vector.broadcast %cst_23 : f32 to vector<8x1xf32>
    %102 = arith.divf %101, %100 : vector<8x1xf32>
    %103 = tpu.iota {dimensions = array<i32: 1>} : vector<8x48xi32>
    %c16_i32 = arith.constant 16 : i32
    %104 = vector.broadcast %c16_i32 : i32 to vector<8x48xi32>
    %105 = arith.cmpi sge, %103, %104 : vector<8x48xi32>
    %c32_i32_24 = arith.constant 32 : i32
    %106 = vector.broadcast %c32_i32_24 : i32 to vector<8x48xi32>
    %107 = arith.cmpi slt, %103, %106 : vector<8x48xi32>
    %108 = arith.andi %105, %107 : vector<8x48xi1>
    %cst_25 = arith.constant 1.000000e+00 : f32
    %109 = vector.shape_cast %102 : vector<8x1xf32> to vector<8x1xf32>
    %110 = vector.broadcast %109 : vector<8x1xf32> to vector<8x48xf32>
    %111 = vector.broadcast %cst_25 : f32 to vector<8x48xf32>
    %112 = arith.select %108, %110, %111 : vector<8x48xi1>, vector<8x48xf32>
    %113 = arith.mulf %97, %112 : vector<8x48xf32>
    %c0_26 = arith.constant 0 : index
    %c0_27 = arith.constant 0 : index
    %114 = vector.load %arg3[%c0_26, %c0_27] : memref<8x48xf32, #tpu.memory_space<vmem>>, vector<8x48xf32>
    tpu.vector_store %arg3[%c0_26, %c0_27], %113 {strides = array<i32>} : memref<8x48xf32, #tpu.memory_space<vmem>>, vector<8x48xf32>,
    return
  }
  func.func @transform_0(%arg0: i32) -> (i32, i32) {
    %c0_i32 = arith.constant 0 : i32
    %c0_i32_0 = arith.constant 0 : i32
    return %arg0, %c0_i32 : i32, i32
  }
  func.func @transform_1(%arg0: i32) -> (i32, i32) {
    %c0_i32 = arith.constant 0 : i32
    %c0_i32_0 = arith.constant 0 : i32
    %c0_i32_1 = arith.constant 0 : i32
    return %c0_i32, %c0_i32_0 : i32, i32
  }
  func.func @transform_2(%arg0: i32) -> (i32, i32) {
    %c0_i32 = arith.constant 0 : i32
    %c0_i32_0 = arith.constant 0 : i32
    return %arg0, %c0_i32 : i32, i32
  }
}

</mosaic_0001>

<bundles_post_ra>
// kernel: embedding_module_forward.1
= control target key start
LH: loop header
LB: loop body
LE: loop exit
PB: predicated region body
PF: predicated region fallthrough
CT: control target
= control target key end

     0   :  { %v309_v1 = vmov 1   ;;  %v310_v3 = vmov 0   ;;  %s405_s0 = inlined_call_operand.vmem [shape: f32[8,8], index: 0, kind: input, shape index: {}]   ;;  %s406_s1 = inlined_call_operand.vmem [shape: f32[72,48], index: 1, kind: input, shape index: {}]   ;;  %s407_s2 = inlined_call_operand.hbm [shape: f32[8,48], index: 2, kind: output, shape index: {}]  }
   0x1   :  { %v14_v0 = vld [vmem:[%s405_s0] sm:$0xff]  ;;  %275 = vset.pattern.permute.xlu1 %v309_v1  ;;  %274 = vset.pattern.permute.xlu0 %v310_v3 }
   0x2   :  { %v259_v2 = vtrunc.f32 %v14_v0  ;;  %vm21_vm0 = vcmp.gt.f32.partialorder %v14_v0, -1.0  ;;  %vm23_vm1 = vcmp.gt.f32.partialorder %v14_v0, 0.2  ;;  %vm26_vm2 = vcmp.gt.f32.partialorder %v14_v0, 0.4 }
   0x3   :  { %v22_v4 = vsel %vm21_vm0, 1, %v310_v3  ;;  %v24_v5 = vsel %vm23_vm1, 1, %v310_v3  ;;  %v27_v6 = vsel %vm26_vm2, 1, %v310_v3  ;;  %vm29_vm3 = vcmp.gt.f32.partialorder %v14_v0, 0.6 }
   0x4   :  { %v260_v7 = vcvt.f32.s32 %v259_v2  ;;  %v25_v8 = vadd.s32 %v24_v5, %v22_v4  ;;  %vm32_vm4 = vcmp.gt.f32.partialorder %v14_v0, 0.8 }
   0x5   :  { %7 = vsyncpa [#allocation3], 0  ;;  %v30_v9 = vsel %vm29_vm3, 1, %v310_v3  ;;  %vm35_vm6 = vcmp.gt.f32.partialorder %v14_v0, 2.0  ;;  %v33_v12 = vsel %vm32_vm4, 1, %v310_v3  ;;  %v311_v16 = vmov 5  }
   0x6   :  { %v46_v10 = vadd.s32 32, %v260_v7  ;;  %17 = vperm.xlu0 %274, %v260_v7   ;;  %vm45_vm5 = vcmp.ne.s32.totalorder %v260_v7, 0  ;;  %v28_v11 = vadd.s32 %v27_v6, %v25_v8  ;;  %v36_v15 = vsel %vm35_vm6, 1, %v310_v3  ;;  %v102_v21 = vld [vmem:[%s406_s1] sm:$0xff]  ;;  %v103_v22 = vld [vmem:[%s406_s1 + $0x8] sm:$0xff]  ;;  %v104_v26 = vld [vmem:[%s406_s1 + $0x10] sm:$0xff] }
   0x7   :  { %v348_v14 = vsel %vm45_vm5, 1, %v310_v3  ;;  %v312_v20 = vmov 2   ;;  %v248_v23 = vpack.c.bf16 %v103_v22, %v102_v21  ;;  %v313_v24 = vmov 0.0|0.0   ;;  %v105_v27 = vld [vmem:[%s406_s1 + $0x18] sm:$0xff]  ;;  %v106_v30 = vld [vmem:[%s406_s1 + $0x20] sm:$0xff]  ;;  %v107_v31 = vld [vmem:[%s406_s1 + $0x28] sm:$0xff] }
   0x8   :  { %48 = vperm.xlu1 %275, %v46_v10   ;;  %v31_v13 = vadd.s32 %v30_v9, %v28_v11  ;;  %247 = vmatprep.subr.bf16.mxu0 %v313_v24  ;;  %v314_v25 = vmov 3   ;;  %v251_v28 = vpack.c.bf16 %v105_v27, %v104_v26  ;;  %v315_v29 = vmov 4   ;;  %s316_s22 = smov 126   ;;  %v108_v33 = vld [vmem:[%s406_s1 + $0x30] sm:$0xff]  ;;  %v109_v34 = vld [vmem:[%s406_s1 + $0x38] sm:$0xff]  ;;  %s317_s27 = smov 127  }
   0x9   :  { %249 = vmatpush3.bf16.msra.mxu0 %v248_v23  ;;  %v254_v32 = vpack.c.bf16 %v107_v31, %v106_v30  ;;  %v257_v35 = vpack.c.bf16 %v109_v34, %v108_v33  ;;  %v318_v36 = vmov 0.0   ;;  %v110_v37 = vld [vmem:[%s406_s1 + $0x40] sm:$0xff]  ;;  %vm319_vm7 = vmmov 0   ;;  %s320_s30 = smov 125   ;;  %s321_s1 = smov [#allocation2]  }
   0xa   :  { %277 = vset.pattern.permute.xlu0 %v311_v16  ;;  %v34_v17 = vadd.s32 %v33_v12, %v31_v13  ;;  %250 = vmatprep.subr.bf16.mxu0 %v313_v24  ;;  %v12_v41 = vlaneseq  ;;  %vm111_vm6 = vcmask 588800   ;;  %s207_s3 = sshll.u32 %s321_s1, 4  ;;  %s208_s3 = int_to_ptr.vmem [resolvable:$true] %s207_s3 }
   0xb   :  { %244 = vmatprep.mubr.msk.f32.mxu0 %vm319_vm7, %v318_v36  ;;  %s285_s4 = scalar_lea.vmem %s208_s3, 128  ;;  %p290_p1 = scmp.lt.s32.totalorder %s208_s3, %s208_s3 }
   0xc   :  { %53 = vperm.xlu1 %275, %v348_v14   ;;  %v37_v18 = vadd.s32 %v36_v15, %v34_v17  ;;  %v13_v43 = vand.u32 127, %v12_v41  ;;  %p286_p0 = scmp.ne.s32.totalorder %s208_s3, %s285_s4  ;;  %p291_p2 = scmp.lt.s32.totalorder %s285_s4, %s285_s4 }
   0xd   :  { %252 = vmatpush3.bf16.msra.mxu0 %v251_v28 }
   0xe   :  { %v38_v19 = vadd.s32 64, %v37_v18  ;;  %253 = vmatprep.subr.bf16.mxu0 %v313_v24  ;;  %vm189_vm7 = vcmp.ge.s32.totalorder %v13_v43, 16  ;;  %p292_p3 = por %p291_p2, %p290_p1 }
  0x10   :  { %40 = vperm.xlu0 %277, %v38_v19   ;;  %276 = vset.pattern.permute.xlu1 %v312_v20  ;;  %p293_p4 = pnand %p292_p3, %p286_p0 }
  0x11   :  { %60 = vperm.xlu1 %276, %v46_v10   ;;  %255 = vmatpush3.bf16.msra.mxu0 %v254_v32 }
  0x12   :  { %256 = vmatprep.subr.bf16.mxu0 %v313_v24 }
  0x14   :  { %278 = vset.pattern.permute.xlu0 %v312_v20 }
  0x15   :  { %64 = vperm.xlu0 %278, %v348_v14   ;;  %279 = vset.pattern.permute.xlu1 %v314_v25 }
  0x16   :  { %74 = vperm.xlu1 %279, %v46_v10   ;;  %258 = vmatpush3.bf16.msra.mxu0 %v257_v35 }
  0x17   :  { %242 = vmatprep.subr.mxu0 %v318_v36 }
  0x19   :  { %280 = vset.pattern.permute.xlu0 %v315_v29 }
  0x1a   :  { %78 = vperm.xlu1 %279, %v348_v14   ;;  %88 = vperm.xlu0 %280, %v46_v10  }
  0x1b   :  { %243 = vmatpush3.msra.mxu0 %v110_v37 }
  0x1e   :  { %281 = vset.pattern.permute.xlu1 %v315_v29  ;;  %84 = vrot.lane.b32.xlu0 %v348_v14, %s316_s22 }
  0x1f   :  { %92 = vperm.xlu1 %281, %v348_v14   ;;  %282 = vset.pattern.permute.xlu0 %v309_v1 }
  0x23   :  { %70 = vrot.lane.b32.xlu1 %v348_v14, %s317_s27 }
  0x27   :  { %98 = vrot.lane.b32.xlu1 %v348_v14, %s320_s30 }
  0x85   :  { %v18_v39 = vpop.permute.xlu0 %17 }
  0x86   :  { %vm19_vm8 = vcmp.eq.s32.totalorder %v13_v43, %v18_v39 }
  0x87   :  { %v49_v38 = vpop.permute.xlu1 %48  ;;  %v20_v46 = vsel %vm19_vm8, 1, %v310_v3  ;;  %vm190_vm8 = vcmp.lt.s32.totalorder %v13_v43, 32 }
  0x88   :  { %vm50_vm12 = vcmp.eq.s32.totalorder %v13_v43, %v49_v38 }
  0x8b   :  { %v54_v40 = vpop.permute.xlu1 %53 }
  0x8c   :  { %vm55_vm10 = vcmp.eq.s32.totalorder %v54_v40, 1 }
  0x8d   :  { %vm56_vm13 = vmand %vm50_vm12, %vm55_vm10  ;;  %vm199_vm10 = vcmask 392192  }
  0x8e   :  { %v57_v52 = vsel %vm56_vm13, 1, %v310_v3 }
  0x8f   :  { %v41_v42 = vpop.permute.xlu0 %40 }
  0x90   :  { %v61_v44 = vpop.permute.xlu1 %60  ;;  %vm42_vm9 = vcmp.eq.s32.totalorder %v13_v43, %v41_v42 }
  0x91   :  { %v43_v47 = vsel %vm42_vm9, 1, %v310_v3  ;;  %vm62_vm14 = vcmp.eq.s32.totalorder %v13_v43, %v61_v44  ;;  %vm191_vm9 = vmand %vm189_vm7, %vm190_vm8 }
  0x92   :  { %v44_v49 = vadd.s32 %v43_v47, %v20_v46 }
  0x94   :  { %v65_v45 = vpop.permute.xlu0 %64  ;;  %v58_v54 = vadd.s32 %v57_v52, %v44_v49 }
  0x95   :  { %vm66_vm11 = vcmp.eq.s32.totalorder %v65_v45, 1  ;;  %v75_v48 = vpop.permute.xlu1 %74 }
  0x96   :  { %vm67_vm15 = vmand %vm62_vm14, %vm66_vm11  ;;  %vm76_vm0 = vcmp.eq.s32.totalorder %v13_v43, %v75_v48 }
  0x97   :  { %v68_v53 = vsel %vm67_vm15, 1, %v310_v3 }
  0x98   :  { %v69_v56 = vadd.s32 %v68_v53, %v58_v54 }
  0x99   :  { %v79_v50 = vpop.permute.xlu1 %78  ;;  %v89_v51 = vpop.permute.xlu0 %88 }
  0x9a   :  { %vm80_vm1 = vcmp.eq.s32.totalorder %v79_v50, 1  ;;  %vm90_vm3 = vcmp.eq.s32.totalorder %v13_v43, %v89_v51 }
  0x9b   :  { %vm81_vm2 = vmand %vm76_vm0, %vm80_vm1 }
  0x9c   :  { %v82_v55 = vsel %vm81_vm2, 1, %v310_v3 }
  0x9d   :  { %v83_v58 = vadd.s32 %v82_v55, %v69_v56  ;;  %v85_v62 = vpop.permute.xlu0 %84 }
  0x9e   :  { %v93_v57 = vpop.permute.xlu1 %92 }
  0x9f   :  { %vm94_vm4 = vcmp.eq.s32.totalorder %v93_v57, 1 }
  0xa0   :  { %vm95_vm5 = vmand %vm90_vm3, %vm94_vm4 }
  0xa1   :  { %v96_v59 = vsel %vm95_vm5, 1, %v310_v3 }
  0xa2   :  { %v97_v60 = vadd.s32 %v96_v59, %v83_v58  ;;  %v71_v61 = vpop.permute.xlu1 %70 }
  0xa3   :  { %v72_v63 = vadd.s32 %v71_v61, %v348_v14 }
  0xa4   :  { %v101_v0 = vcvt.s32.f32 %v97_v60 }
  0xa5   :  { %v86_v1 = vadd.s32 %v85_v62, %v72_v63 }
  0xa6   :  { %245 = vmatmul.mubr.msk.f32.vlgmr.msra.gmra.mrb[0].mxu0 %vm111_vm6, %v101_v0  ;;  %v99_v2 = vpop.permute.xlu1 %98 }
  0xa7   :  { %v100_v4 = vadd.s32 %v99_v2, %v86_v1 }
  0xa9   :  { %v185_v5 = vcvt.s32.f32 %v100_v4 }
  0xab   :  { %v186_v6 = vmax.f32 %v185_v5, 1.0 }
  0xad   :  { %283 = vrcp.f32 %v186_v6 }
  0xb7   :  { %v284_v7 = vpop.eup %283 }
  0xb8   :  { %194 = vperm.xlu0 %282, %v284_v7  }
 0x137   :  { %v195_v8 = vpop.permute.xlu0 %194 }
 0x138   :  { %v197_v3 = vsel %vm191_vm9, %v195_v8, 1.0 }
 0x179   :  { %v181_v9 = vpop.f32.mrb[0].mxu0 }
 0x17a   :  { %v198_v10 = vmul.f32 %v197_v3, %v181_v9  ;;  %v246_v11 = vpop.f32.mrb[1].mxu0 }
 0x17c   :  { %200 = vst.msk [vmem:[#allocation2] sm:$0xff] %vm199_vm10, %v198_v10 }
 0x17d   :  { %296 = shalt.err (!%p293_p4)
}
 0x17e   :  { %s297_s7 = scalar_lea.hbm %s407_s2, 128 }
 0x17f   :  { %p298_p5 = scmp.ne.s32.totalorder %s407_s2, %s297_s7  ;;  %p301_p6 = scmp.lt.u32.totalorder %s297_s7, %s407_s2 }
 0x181   :  { %p303_p7 = pnand %p301_p6, %p298_p5 }
 0x183   :  { %306 = shalt.err (!%p303_p7)
}
 0x184   :  { %210 = dma.vmem_to_hbm [thread:$0]  %s208_s3, 128, %s407_s2, [#allocation3]  }
 0x185   :  { %307 = dma.done.wait [#allocation3], 128  }
 0x186   :  { %308 = vsyncadd [#allocation3], 4294967168 }
 0x187   :  { %214 = vsyncpa [#allocation3], 1 }

</bundles_post_ra>
